<compile_context>
chip_gen: v7x
topology: tpu7x:2x2x1
jax: 0.10.0
libtpu: 0.0.40
codegen_flags: <defaults>
</compile_context>

<pallas_src>
import functools

import jax
import jax.numpy as jnp
from jax.experimental import pallas as pl
from jax.experimental.pallas import tpu as pltpu


def _round_up(x, m):
    return (x + m - 1) // m * m


def _vmem_budget_bytes():
    """Usable scoped-VMEM budget for this chip generation (physical minus headroom)."""
    cap = 64 << 20                      # conservative fallback (v7x per-TC VMEM)
    try:
        cap = int(pltpu.get_tpu_info().vmem_capacity_bytes)
    except Exception:
        pass
    return max(cap - (16 << 20), 32 << 20)


# ----------------------------------------------------------------------------- kernels
def _ffn_resident_kernel(x_ref, w1_ref, b1_ref, w2_ref, b2_ref, o_ref):
    """One (TM, dm_p) row tile of relu(x@W1+b1)@W2 + b2 + x; weights VMEM-resident."""
    x = x_ref[...]                                        # single VMEM load per tile
    x_bf = x if x.dtype == jnp.bfloat16 else x.astype(jnp.bfloat16)
    h = jnp.dot(x_bf, w1_ref[...], preferred_element_type=jnp.float32)
    h = jnp.maximum(h + b1_ref[...], 0.0)                 # (TM, dff_p) f32
    y = jnp.dot(h.astype(jnp.bfloat16), w2_ref[...],
                preferred_element_type=jnp.float32)       # (TM, dm_p) f32
    o_ref[...] = (y + b2_ref[...] + x.astype(jnp.float32)).astype(o_ref.dtype)
    # TODO(synk): dropout with p > 0 would need pltpu.prng_seed/prng_random_bits
    # masking; the module defaults to p = 0.0 (identity / eval), so it is omitted.


def _ffn_stream_kernel(x_ref, w1_ref, b1_ref, w2_ref, b2_ref, o_ref, acc_ref):
    """d_ff-streaming variant: grid axis 1 walks (dm_p, TK)/(TK, dm_p) weight panels."""
    k = pl.program_id(1)

    @pl.when(k == 0)
    def _():
        acc_ref[...] = jnp.zeros_like(acc_ref)

    x = x_ref[...]                                        # single VMEM load per tile
    x_bf = x if x.dtype == jnp.bfloat16 else x.astype(jnp.bfloat16)
    h = jnp.dot(x_bf, w1_ref[...], preferred_element_type=jnp.float32)
    h = jnp.maximum(h + b1_ref[...], 0.0)                 # (TM, TK) chunk of relu(...)
    acc_ref[...] += jnp.dot(h.astype(jnp.bfloat16), w2_ref[...],
                            preferred_element_type=jnp.float32)

    @pl.when(k == pl.num_programs(1) - 1)
    def _():
        o_ref[...] = (acc_ref[...] + b2_ref[...]
                      + x.astype(jnp.float32)).astype(o_ref.dtype)


# ----------------------------------------------------------------------------- wrapper
def prepare_ffn_params(w1, b1, w2, b2):
    """One-time weight prep (do NOT call per forward): pad lane dims to multiples of
    128 and cast matmul weights to bf16.  Layout is (in, out): w1 (d_model, d_ff),
    w2 (d_ff, d_model); biases become f32 row vectors."""
    d_model, d_ff = w1.shape
    dm_p, dff_p = _round_up(d_model, 128), _round_up(d_ff, 128)
    w1_p = jnp.pad(w1, ((0, dm_p - d_model), (0, dff_p - d_ff))).astype(jnp.bfloat16)
    w2_p = jnp.pad(w2, ((0, dff_p - d_ff), (0, dm_p - d_model))).astype(jnp.bfloat16)
    b1_p = jnp.pad(jnp.asarray(b1, jnp.float32).reshape(1, d_ff),
                   ((0, 0), (0, dff_p - d_ff)))
    b2_p = jnp.pad(jnp.asarray(b2, jnp.float32).reshape(1, d_model),
                   ((0, 0), (0, dm_p - d_model)))
    return w1_p, b1_p, w2_p, b2_p


@functools.partial(jax.jit, static_argnames=("tm", "tk_ff", "force_stream"))
def feed_forward(x, w1_p, b1_p, w2_p, b2_p, *, tm=512, tk_ff=None, force_stream=False):
    """x: (B, S, d_model) -> (B, S, d_model).  Weights come pre-padded / pre-cast
    from prepare_ffn_params (bf16, lane dims multiples of 128)."""
    B, S, d_model = x.shape
    M = B * S
    dm_p, dff_p = w1_p.shape
    assert dm_p == _round_up(d_model, 128), "weights must come from prepare_ffn_params"

    xb = jnp.dtype(x.dtype).itemsize
    ob = xb

    # ---- row tile -----------------------------------------------------------
    tm_eff = max(8, _round_up(min(tm, M), 8))
    # v7x megacore: give both TensorCores at least one row tile.
    if M >= 16 and _round_up(M, tm_eff) // tm_eff < 2:
        tm_eff = max(8, _round_up(-(-M // 2), 8))

    budget = _vmem_budget_bytes()

    def resident_need(t):
        need = 2 * dm_p * dff_p * 2           # W1 + W2, bf16, single-buffered
        need += 2 * t * dm_p * xb             # x tiles (double-buffered)
        need += 2 * t * dm_p * ob             # out tiles (double-buffered)
        need += t * dff_p * (4 + 2)           # h intermediate f32 + bf16 copy
        need += 2 * (dm_p + dff_p) * 4        # biases
        return need

    use_stream = bool(force_stream) or resident_need(min(tm_eff, 128)) > budget
    if not use_stream:
        while tm_eff > 128 and resident_need(tm_eff) > budget:
            tm_eff = max(128, tm_eff // 2)
    else:
        tm_eff = min(tm_eff, 256)             # accumulator + h chunk scale with TM

    m_p = _round_up(M, tm_eff)
    grid_m = m_p // tm_eff

    # ---- activations: pad only when actually needed ---------------------------
    x2d = x.reshape(M, d_model)
    if m_p != M or dm_p != d_model:
        # TODO(synk): a masked ragged last tile (pl.when + pltpu.store with a lane
        # mask) would remove this HBM copy too; the aligned fast path skips it.
        x2d = jnp.pad(x2d, ((0, m_p - M), (0, dm_p - d_model)))

    resident = pl.Buffered(1)   # constant index_map -> no second pipeline buffer

    if not use_stream:
        need = resident_need(tm_eff)
        grid_spec = pltpu.PrefetchScalarGridSpec(
            num_scalar_prefetch=0,
            grid=(grid_m,),
            in_specs=[
                pl.BlockSpec((tm_eff, dm_p), lambda i: (i, 0)),                    # x
                pl.BlockSpec((dm_p, dff_p), lambda i: (0, 0), pipeline_mode=resident),  # W1
                pl.BlockSpec((1, dff_p), lambda i: (0, 0), pipeline_mode=resident),     # b1
                pl.BlockSpec((dff_p, dm_p), lambda i: (0, 0), pipeline_mode=resident),  # W2
                pl.BlockSpec((1, dm_p), lambda i: (0, 0), pipeline_mode=resident),      # b2
            ],
            out_specs=pl.BlockSpec((tm_eff, dm_p), lambda i: (i, 0)),
        )
        kernel = _ffn_resident_kernel
        dims = ("parallel",)
    else:
        if tk_ff is not None:
            tk = int(tk_ff)
        else:
            tk = dff_p
            for cand in (2048, 1024, 512, 256, 128):
                if dff_p % cand == 0:
                    tk = cand
                    break
        assert dff_p % tk == 0 and tk % 128 == 0
        need = (2 * 2 * dm_p * tk * 2                      # W1/W2 panels, double-buffered
                + 2 * tm_eff * dm_p * xb + 2 * tm_eff * dm_p * ob
                + tm_eff * tk * (4 + 2)                    # h chunk f32 + bf16 copy
                + tm_eff * dm_p * 4                        # f32 accumulator
                + 2 * (dm_p + tk) * 4)
        grid_spec = pltpu.PrefetchScalarGridSpec(
            num_scalar_prefetch=0,
            grid=(grid_m, dff_p // tk),
            in_specs=[
                pl.BlockSpec((tm_eff, dm_p), lambda i, k: (i, 0)),                 # x
                pl.BlockSpec((dm_p, tk), lambda i, k: (0, k)),                     # W1 panel
                pl.BlockSpec((1, tk), lambda i, k: (0, k)),                        # b1 chunk
                pl.BlockSpec((tk, dm_p), lambda i, k: (k, 0)),                     # W2 panel
                pl.BlockSpec((1, dm_p), lambda i, k: (0, 0), pipeline_mode=resident),  # b2
            ],
            out_specs=pl.BlockSpec((tm_eff, dm_p), lambda i, k: (i, 0)),
            scratch_shapes=[pltpu.VMEM((tm_eff, dm_p), jnp.float32)],
        )
        kernel = _ffn_stream_kernel
        dims = ("parallel", "arbitrary")

    vmem_limit = int(min(max(need + (8 << 20), 32 << 20), budget))

    out2d = pl.pallas_call(
        kernel,
        out_shape=jax.ShapeDtypeStruct((m_p, dm_p), x.dtype),
        grid_spec=grid_spec,
        compiler_params=pltpu.CompilerParams(
            dimension_semantics=dims,
            vmem_limit_bytes=vmem_limit),
    )(x2d, w1_p, b1_p, w2_p, b2_p)

    if m_p != M or dm_p != d_model:
        out2d = out2d[:M, :d_model]
    return out2d.reshape(B, S, d_model)


# ----------------------------------------------------------------------------- helpers
def init_params(key, d_model, d_ff, dtype=jnp.float32):
    """Deterministic init matching torch.nn.Linear's U(-1/sqrt(fan_in), 1/sqrt(fan_in))."""
    k1, k2, k3, k4 = jax.random.split(key, 4)
    bound1 = 1.0 / (d_model ** 0.5)
    bound2 = 1.0 / (d_ff ** 0.5)
    w1 = jax.random.uniform(k1, (d_model, d_ff), dtype, -bound1, bound1)
    b1 = jax.random.uniform(k2, (1, d_ff), dtype, -bound1, bound1)
    w2 = jax.random.uniform(k3, (d_ff, d_model), dtype, -bound2, bound2)
    b2 = jax.random.uniform(k4, (1, d_model), dtype, -bound2, bound2)
    return w1, b1, w2, b2


def _reference(x, w1, b1, w2, b2):
    # Same precision path as the kernel (bf16 MXU operands, f32 accumulation,
    # f32 bias + residual) so tolerances stay tight.
    h = jnp.maximum(
        jnp.dot(x.astype(jnp.bfloat16), w1.astype(jnp.bfloat16),
                preferred_element_type=jnp.float32) + b1.reshape(-1), 0.0)
    y = jnp.dot(h.astype(jnp.bfloat16), w2.astype(jnp.bfloat16),
                preferred_element_type=jnp.float32) + b2.reshape(-1)
    return y + x


if __name__ == "__main__":
    key = jax.random.PRNGKey(0)
    kx, kp, kx2, kp2 = jax.random.split(key, 4)

    # Plan A: resident-weight kernel (the common case).
    B, S, d_model, d_ff = 2, 8, 32, 64
    x = jax.random.normal(kx, (B, S, d_model), jnp.float32)
    w1, b1, w2, b2 = init_params(kp, d_model, d_ff)
    params = prepare_ffn_params(w1, b1, w2, b2)        # one-time weight prep
    out = jax.block_until_ready(feed_forward(x, *params))
    assert out.shape == (B, S, d_model)
    ref = _reference(x, w1, b1, w2, b2)
    assert jnp.allclose(out, ref.astype(out.dtype), atol=2e-3, rtol=2e-3), \
        float(jnp.max(jnp.abs(out - ref)))

    # Plan B: d_ff-streaming kernel (forced, 2 reduction steps) — the path taken on
    # v7x when resident weights no longer fit its 64 MiB per-TC VMEM.
    d_ff2 = 256
    x2 = jax.random.normal(kx2, (B, S, d_model), jnp.float32)
    w1s, b1s, w2s, b2s = init_params(kp2, d_model, d_ff2)
    params2 = prepare_ffn_params(w1s, b1s, w2s, b2s)
    out2 = jax.block_until_ready(
        feed_forward(x2, *params2, force_stream=True, tk_ff=128))
    ref2 = _reference(x2, w1s, b1s, w2s, b2s)
    assert jnp.allclose(out2, ref2.astype(out2.dtype), atol=2e-3, rtol=2e-3), \
        float(jnp.max(jnp.abs(out2 - ref2)))

    print("KERNEL_OK")
</pallas_src>

<mosaic_0001>
module attributes {stable_mosaic.version = 11 : i64} {
  func.func @_ffn_resident_kernel(%arg0: i32, %arg1: memref<8x128xf32, #tpu.memory_space<vmem>>, %arg2: memref<128x128xbf16, #tpu.memory_space<vmem>>, %arg3: memref<1x128xf32, #tpu.memory_space<vmem>>, %arg4: memref<128x128xbf16, #tpu.memory_space<vmem>>, %arg5: memref<1x128xf32, #tpu.memory_space<vmem>>, %arg6: memref<8x128xf32, #tpu.memory_space<vmem>>) attributes {dimension_semantics = [#tpu.dimension_semantics<parallel>], iteration_bounds = array<i64: 2>, scalar_prefetch = 0 : i64, scratch_operands = 0 : i64, tpu.core_type = #tpu.core_type<tc>, window_params = [{transform_indices = @transform_0, window_bounds = array<i64: 8, 128>}, {pipeline_mode = #tpu.pipeline_mode<synchronous>, transform_indices = @transform_1, window_bounds = array<i64: 128, 128>}, {pipeline_mode = #tpu.pipeline_mode<synchronous>, transform_indices = @transform_2, window_bounds = array<i64: 1, 128>}, {pipeline_mode = #tpu.pipeline_mode<synchronous>, transform_indices = @transform_3, window_bounds = array<i64: 128, 128>}, {pipeline_mode = #tpu.pipeline_mode<synchronous>, transform_indices = @transform_4, window_bounds = array<i64: 1, 128>}, {transform_indices = @transform_5, window_bounds = array<i64: 8, 128>}]} {
    %c0 = arith.constant 0 : index
    %c0_0 = arith.constant 0 : index
    %0 = vector.load %arg1[%c0, %c0_0] : memref<8x128xf32, #tpu.memory_space<vmem>>, vector<8x128xf32>
    %1 = arith.truncf %0 : vector<8x128xf32> to vector<8x128xbf16>
    %c0_1 = arith.constant 0 : index
    %c0_2 = arith.constant 0 : index
    %2 = vector.load %arg2[%c0_1, %c0_2] : memref<128x128xbf16, #tpu.memory_space<vmem>>, vector<128x128xbf16>
    %cst = arith.constant dense<0.000000e+00> : vector<8x128xf32>
    %3 = tpu.matmul %1, %2, %cst {dimension_numbers = #tpu.dot_dimension_numbers<[1], [0], [0], [1], [0, 0, 1, 1], [], []>} : vector<8x128xbf16>, vector<128x128xbf16>, vector<8x128xf32> -> vector<8x128xf32>
    %c0_3 = arith.constant 0 : index
    %c0_4 = arith.constant 0 : index
    %4 = vector.load %arg3[%c0_3, %c0_4] : memref<1x128xf32, #tpu.memory_space<vmem>>, vector<1x128xf32>
    %5 = vector.broadcast %4 : vector<1x128xf32> to vector<8x128xf32>
    %6 = arith.addf %3, %5 : vector<8x128xf32>
    %cst_5 = arith.constant 0.000000e+00 : f32
    %7 = vector.broadcast %cst_5 : f32 to vector<8x128xf32>
    %8 = arith.maximumf %6, %7 : vector<8x128xf32>
    %9 = arith.truncf %8 : vector<8x128xf32> to vector<8x128xbf16>
    %c0_6 = arith.constant 0 : index
    %c0_7 = arith.constant 0 : index
    %10 = vector.load %arg4[%c0_6, %c0_7] : memref<128x128xbf16, #tpu.memory_space<vmem>>, vector<128x128xbf16>
    %cst_8 = arith.constant dense<0.000000e+00> : vector<8x128xf32>
    %11 = tpu.matmul %9, %10, %cst_8 {dimension_numbers = #tpu.dot_dimension_numbers<[1], [0], [0], [1], [0, 0, 1, 1], [], []>} : vector<8x128xbf16>, vector<128x128xbf16>, vector<8x128xf32> -> vector<8x128xf32>
    %c0_9 = arith.constant 0 : index
    %c0_10 = arith.constant 0 : index
    %12 = vector.load %arg5[%c0_9, %c0_10] : memref<1x128xf32, #tpu.memory_space<vmem>>, vector<1x128xf32>
    %13 = vector.broadcast %12 : vector<1x128xf32> to vector<8x128xf32>
    %14 = arith.addf %11, %13 : vector<8x128xf32>
    %15 = arith.addf %14, %0 : vector<8x128xf32>
    %c0_11 = arith.constant 0 : index
    %c0_12 = arith.constant 0 : index
    %16 = vector.load %arg6[%c0_11, %c0_12] : memref<8x128xf32, #tpu.memory_space<vmem>>, vector<8x128xf32>
    tpu.vector_store %arg6[%c0_11, %c0_12], %15 {strides = array<i32>} : memref<8x128xf32, #tpu.memory_space<vmem>>, vector<8x128xf32>,
    return
  }
  func.func @transform_0(%arg0: i32) -> (i32, i32) {
    %c0_i32 = arith.constant 0 : i32
    %c0_i32_0 = arith.constant 0 : i32
    return %arg0, %c0_i32 : i32, i32
  }
  func.func @transform_1(%arg0: i32) -> (i32, i32) {
    %c0_i32 = arith.constant 0 : i32
    %c0_i32_0 = arith.constant 0 : i32
    %c0_i32_1 = arith.constant 0 : i32
    return %c0_i32, %c0_i32_0 : i32, i32
  }
  func.func @transform_2(%arg0: i32) -> (i32, i32) {
    %c0_i32 = arith.constant 0 : i32
    %c0_i32_0 = arith.constant 0 : i32
    %c0_i32_1 = arith.constant 0 : i32
    return %c0_i32, %c0_i32_0 : i32, i32
  }
  func.func @transform_3(%arg0: i32) -> (i32, i32) {
    %c0_i32 = arith.constant 0 : i32
    %c0_i32_0 = arith.constant 0 : i32
    %c0_i32_1 = arith.constant 0 : i32
    return %c0_i32, %c0_i32_0 : i32, i32
  }
  func.func @transform_4(%arg0: i32) -> (i32, i32) {
    %c0_i32 = arith.constant 0 : i32
    %c0_i32_0 = arith.constant 0 : i32
    %c0_i32_1 = arith.constant 0 : i32
    return %c0_i32, %c0_i32_0 : i32, i32
  }
  func.func @transform_5(%arg0: i32) -> (i32, i32) {
    %c0_i32 = arith.constant 0 : i32
    %c0_i32_0 = arith.constant 0 : i32
    return %arg0, %c0_i32 : i32, i32
  }
}

</mosaic_0001>

<bundles_post_ra>
// kernel: feed_forward.1
= control target key start
LH: loop header
LB: loop body
LE: loop exit
PB: predicated region body
PF: predicated region fallthrough
CT: control target
= control target key end

     0   :  { %10 = vsyncpa [#allocation3], 0  ;;  %s906_s0 = inlined_call_operand.vmem [shape: f32[16,128], index: 0, kind: input, shape index: {}]   ;;  %s907_s1 = inlined_call_operand.hbm [shape: bf16[128,128], index: 1, kind: input, shape index: {}]   ;;  %s908_s2 = inlined_call_operand.vmem [shape: f32[1,128], index: 2, kind: input, shape index: {}]   ;;  %s909_s3 = inlined_call_operand.hbm [shape: bf16[128,128], index: 3, kind: input, shape index: {}]   ;;  %s910_s4 = inlined_call_operand.vmem [shape: f32[1,128], index: 4, kind: input, shape index: {}]   ;;  %s911_s5 = inlined_call_operand.vmem [shape: f32[16,128], index: 5, kind: output, shape index: {}]  }
   0x1   :  { %11 = vsyncpa [#allocation5], 0  ;;  %s800_s18 = smov 0  }
   0x2 LB: > { %s806_s19 = sadd.s32 4294967295, %s762_s18   ;;  %p556_p0 = scmp.ge.s32.totalorder %s762_s18, 1  ;;  %s762_s18 = sphi %s800_s18, %s17_s18  }
   0x3   : > { %p158_p1 = scmp.lt.s32.totalorder %s762_s18, 3  ;;  %s764_s20 = smov [#allocation2]  }
   0x4   : > { %s170_s21 = sshll.u32 %s764_s20, 4  ;;  %p912_p3 = scmp.eq.s32.totalorder %s806_s19, 0  ;;  %s171_s21 = int_to_ptr.vmem [resolvable:$true] %s170_s21 }
   0x5   : > { %p810_p2 = pnand %p556_p0, %p158_p1  ;;  %s765_s23 = smov [#allocation4]  }
   0x6   : > { %s186_s24 = sshll.u32 %s765_s23, 4  ;;  %s692_s28 = scalar_lea.hbm %s907_s1, 1024  ;;  %s823_s24 = int_to_ptr.vmem [resolvable:$true] %s186_s24 }
   0x7   : > { %s914_s22 = scalar_select %p810_p2, 1, 0 }
   0x8   : > { %p651_p4 = pneg %p810_p2  ;;  %p693_p6 = scmp.ne.s32.totalorder %s907_s1, %s692_s28 }
   0x9   : > { %p699_p10 = scmp.lt.u32.totalorder %s692_s28, %s907_s1 }
   0xa   : > { %p819_p5 = pnand %p912_p3, %p651_p4 }
   0xc   : > { %p694_p7 = pneg %p819_p5 }
   0xe   : > { %p695_p8 = pnand %p694_p7, %p693_p6 }
  0x10   : > { %p696_p9 = pneg %p695_p8 }
  0x12   : > { %p701_p11 = pnand %p699_p10, %p696_p9 }
  0x14   : > { %704 = shalt.err (!%p701_p11)
}
  0x15   : > { %s705_s8 = scalar_lea.vmem %s171_s21, 1024  ;;  %p713_p1 = scmp.lt.s32.totalorder %s171_s21, %s171_s21 }
  0x16   : > { %p706_p12 = scmp.ne.s32.totalorder %s171_s21, %s705_s8  ;;  %p714_p4 = scmp.lt.s32.totalorder %s705_s8, %s705_s8 }
  0x18   : > { %p708_p13 = pnand %p706_p12, %p694_p7  ;;  %p715_p3 = por %p714_p4, %p713_p1 }
  0x1a   : > { %p709_p0 = pneg %p708_p13 }
  0x1c   : > { %p716_p2 = pnand %p715_p3, %p709_p0 }
  0x1e   : > { %719 = shalt.err (!%p716_p2)
}
  0x1f   : > { %s766_s9 = smov 64   ;;  %s767_s10 = smov 4  }
  0x20   : > { %654 = dma.hbm_to_vmem [thread:$0]  (!%p819_p5), %s907_s1, 1024, %s171_s21, [#allocation3], %s766_s9, %s766_s9, %s767_s10  }
  0x21   : > { %s720_s15 = scalar_lea.hbm %s909_s3, 1024 }
  0x22   : > { %p721_p6 = scmp.ne.s32.totalorder %s909_s3, %s720_s15  ;;  %p727_p8 = scmp.lt.u32.totalorder %s720_s15, %s909_s3 }
  0x24   : > { %p723_p2 = pnand %p721_p6, %p694_p7 }
  0x26   : > { %p724_p3 = pneg %p723_p2 }
  0x28   : > { %p729_p9 = pnand %p727_p8, %p724_p3 }
  0x2a   : > { %732 = shalt.err (!%p729_p9)
}
  0x2b   : > { %s733_s21 = scalar_lea.vmem %s823_s24, 1024  ;;  %p741_p13 = scmp.lt.s32.totalorder %s823_s24, %s823_s24 }
  0x2c   : > { %p734_p10 = scmp.ne.s32.totalorder %s823_s24, %s733_s21  ;;  %p742_p0 = scmp.lt.s32.totalorder %s733_s21, %s733_s21 }
  0x2e   : > { %p736_p11 = pnand %p734_p10, %p694_p7  ;;  %p743_p1 = por %p742_p0, %p741_p13 }
  0x30   : > { %p737_p12 = pneg %p736_p11 }
  0x32   : > { %p744_p4 = pnand %p743_p1, %p737_p12 }
  0x34   : > { %747 = shalt.err (!%p744_p4)
}
  0x35   : > { %657 = dma.hbm_to_vmem [thread:$0]  (!%p819_p5), %s909_s3, 1024, %s823_s24, [#allocation5], %s766_s9, %s766_s9, %s767_s10  }
  0x36   : > { %p916_p6 = scmp.ne.s32.totalorder %s914_s22, 0 }
  0x37   : > { %p917_p2 = scmp.eq.s32.totalorder (!%p916_p6), %s806_s19, 0 }
  0x38   : > { %212 = sbr.rel (%p916_p6) target bundleno = 536 (0x218), region = 40 }
  0x3f   : > { %753 = dma.done.wait (%p917_p2), [#allocation3], 1024   ;;  %p918_p7 = pmov %p917_p2 }
  0x40   : > { %p919_p3 = pmov %p917_p2 }
  0x41   : > { %755 = vsyncadd (%p918_p7), [#allocation3], 4294966272 }
  0x42   : > { %757 = dma.done.wait (%p919_p3), [#allocation5], 1024   ;;  %p920_p8 = pmov %p917_p2 }
  0x43   : > { %v768_v0 = vmov 0.0   ;;  %vm769_vm0 = vmmov 0   ;;  %v676_v1 = vld [vmem:[#allocation2] sm:$0xff]   ;;  %v677_v2 = vld [vmem:[#allocation2 + $0x8] sm:$0xff]   ;;  %v678_v3 = vld [vmem:[#allocation2 + $0x10] sm:$0xff]   ;;  %p242_p5 = scmp.lt.s32.totalorder %s806_s19, 1 }
  0x44   : > { %759 = vsyncadd (%p920_p8), [#allocation5], 4294966272  ;;  %603 = vmatprep.subr.bf16.mxu0 %v768_v0  ;;  %619 = vmatprep.mubr.msk.bf16.mxu0 %vm769_vm0, %v768_v0  ;;  %v684_v4 = vld [vmem:[#allocation4] sm:$0xff]   ;;  %v679_v5 = vld [vmem:[#allocation2 + $0x18] sm:$0xff]  }
  0x45   : > { %623 = vmatprep.subr.bf16.mxu1 %v768_v0  ;;  %639 = vmatprep.mubr.msk.bf16.mxu1 %vm769_vm0, %v768_v0  ;;  %v685_v6 = vld [vmem:[#allocation4 + $0x8] sm:$0xff]   ;;  %v680_v7 = vld [vmem:[#allocation2 + $0x20] sm:$0xff]   ;;  %v686_v8 = vld [vmem:[#allocation4 + $0x10] sm:$0xff]   ;;  %s922_s19 = smov (!%p242_p5, %s806_s19), 1 }
  0x46   : > { %604 = vmatpush3.bf16.msra.mxu0 %v676_v1  ;;  %624 = vmatpush3.bf16.msra.mxu1 %v684_v4  ;;  %v681_v9 = vld [vmem:[#allocation2 + $0x28] sm:$0xff]   ;;  %v687_v10 = vld [vmem:[#allocation4 + $0x18] sm:$0xff]   ;;  %s563_s22 = sshll.u32 %s922_s19, 3  ;;  %v682_v11 = vld [vmem:[#allocation2 + $0x30] sm:$0xff]  }
  0x47   : > { %605 = vmatprep.subr.bf16.mxu0 %v768_v0  ;;  %625 = vmatprep.subr.bf16.mxu1 %v768_v0  ;;  %s245_s28 = scalar_lea.vmem %s906_s0, %s563_s22  ;;  %v688_v12 = vld [vmem:[#allocation4 + $0x20] sm:$0xff]   ;;  %v683_v13 = vld [vmem:[#allocation2 + $0x38] sm:$0xff]   ;;  %v689_v15 = vld [vmem:[#allocation4 + $0x28] sm:$0xff]   ;;  %s249_s10 = scalar_lea.vmem %s911_s5, %s563_s22 }
  0x48   : > { %v251_v14 = vld [vmem:[%s245_s28] sm:$0xff]  ;;  %v690_v17 = vld [vmem:[#allocation4 + $0x30] sm:$0xff]   ;;  %v691_v18 = vld [vmem:[#allocation4 + $0x38] sm:$0xff]  }
  0x49   : > { %v252_v16 = vpack.c.bf16 %v251_v14, %v251_v14  ;;  %v565_v19 = vld [vmem:[%s908_s2] ss:$0 sm:$0xff] }
  0x4a   : > { %606 = vmatpush3.bf16.msra.mxu0 %v677_v2  ;;  %626 = vmatpush3.bf16.msra.mxu1 %v685_v6  ;;  %v574_v27 = vld [vmem:[%s910_s4] ss:$0 sm:$0xff] }
  0x4b   : > { %607 = vmatprep.subr.bf16.mxu0 %v768_v0  ;;  %627 = vmatprep.subr.bf16.mxu1 %v768_v0 }
  0x4e   : > { %608 = vmatpush3.bf16.msra.mxu0 %v678_v3  ;;  %628 = vmatpush3.bf16.msra.mxu1 %v686_v8 }
  0x4f   : > { %609 = vmatprep.subr.bf16.mxu0 %v768_v0  ;;  %629 = vmatprep.subr.bf16.mxu1 %v768_v0 }
  0x52   : > { %610 = vmatpush3.bf16.msra.mxu0 %v679_v5  ;;  %630 = vmatpush3.bf16.msra.mxu1 %v687_v10 }
  0x53   : > { %611 = vmatprep.subr.bf16.mxu0 %v768_v0  ;;  %631 = vmatprep.subr.bf16.mxu1 %v768_v0 }
  0x56   : > { %612 = vmatpush3.bf16.msra.mxu0 %v680_v7  ;;  %632 = vmatpush3.bf16.msra.mxu1 %v688_v12 }
  0x57   : > { %613 = vmatprep.subr.bf16.mxu0 %v768_v0  ;;  %633 = vmatprep.subr.bf16.mxu1 %v768_v0 }
  0x5a   : > { %614 = vmatpush3.bf16.msra.mxu0 %v681_v9  ;;  %634 = vmatpush3.bf16.msra.mxu1 %v689_v15 }
  0x5b   : > { %615 = vmatprep.subr.bf16.mxu0 %v768_v0  ;;  %635 = vmatprep.subr.bf16.mxu1 %v768_v0 }
  0x5e   : > { %616 = vmatpush3.bf16.msra.mxu0 %v682_v11  ;;  %636 = vmatpush3.bf16.msra.mxu1 %v690_v17 }
  0x5f   : > { %617 = vmatprep.subr.bf16.mxu0 %v768_v0  ;;  %637 = vmatprep.subr.bf16.mxu1 %v768_v0 }
  0x62   : > { %618 = vmatpush3.bf16.msra.mxu0 %v683_v13  ;;  %638 = vmatpush3.bf16.msra.mxu1 %v691_v18 }
  0x65   : > { %620 = vmatmul.mubr.bf16.vlgmr.msra.gmra.mrb[0].mxu0 %v252_v16 }
 0x138   : > { %v358_v20 = vpop.f32.mrb[0].mxu0 }
 0x139   : > { %v359_v21 = vadd.f32 %v565_v19, %v358_v20  ;;  %v621_v22 = vpop.f32.mrb[1].mxu0 }
 0x13a   : > { %v361_v23 = vpop.f32.mrb[2].mxu0 }
 0x13b   : > { %v364_v24 = vmax.f32 %v359_v21, 0.0  ;;  %v622_v25 = vpop.f32.mrb[3].mxu0 }
 0x13d   : > { %v365_v26 = vpack.c.bf16 %v364_v24, %v364_v24 }
 0x13f   : > { %640 = vmatmul.mubr.bf16.vlgmr.msra.gmra.mrb[0].mxu1 %v365_v26 }
 0x212   : > { %v471_v28 = vpop.f32.mrb[0].mxu1 }
 0x213   : > { %v472_v29 = vadd.f32 %v574_v27, %v471_v28  ;;  %v641_v30 = vpop.f32.mrb[1].mxu1 }
 0x214   : > { %v474_v31 = vpop.f32.mrb[2].mxu1 }
 0x215   : > { %v477_v32 = vadd.f32 %v472_v29, %v251_v14  ;;  %v642_v33 = vpop.f32.mrb[3].mxu1 }
 0x217   : > { %478 = vst [vmem:[%s249_s10] sm:$0xff] %v477_v32 }
 0x218 PF: > { %s17_s18 = sadd.s32 1, %s762_s18  }
 0x219   : > { %p14_p9 = scmp.ge.s32.totalorder %s17_s18, 4  }
 0x21b   :  { %16 = sbr.rel (!%p14_p9) target bundleno = 2 (0x2), region = 79 }
 0x222   :  { %498 = vsyncpa [#allocation3], 1 }
 0x223   :  { %500 = vsyncpa [#allocation3 + $0x1], 1 }
 0x224   :  { %501 = vsyncpa [#allocation5], 1 }

</bundles_post_ra>
